<compile_context>
chip_gen: v7x
topology: tpu7x:2x2x1
jax: 0.10.0
libtpu: 0.0.40
codegen_flags: <defaults>
</compile_context>

<pallas_src>
import jax
import jax.numpy as jnp
from jax.experimental import pallas as pl
from jax.experimental.pallas import tpu as pltpu

_LANE = 128
_SUBLANE = 8


def _round_up(x: int, m: int) -> int:
    return (x + m - 1) // m * m


def _face_rec_kernel(x_ref, w1_ref, b1_ref, w2_ref, b2_ref, out_ref):
    # ReLU on the input tile.
    x = jnp.maximum(x_ref[...], 0)

    # fc1: (TB, F) @ (F, H) -> (TB, H); MXU with f32 accumulation.
    h = jnp.dot(x, w1_ref[...], preferred_element_type=jnp.float32)
    h = h + b1_ref[...]
    h = jnp.maximum(h, 0.0)

    # fc2: (TB, H) @ (H, LP) -> (TB, LP). Padded label columns carry zero
    # weights and a -1e30 bias, so they contribute exp(...) == 0 below.
    logits = jnp.dot(h.astype(w2_ref.dtype), w2_ref[...],
                     preferred_element_type=jnp.float32)
    logits = logits + b2_ref[...]

    # Numerically-stable softmax over the (lane-dense, padded) label axis.
    m = jnp.max(logits, axis=1, keepdims=True)
    e = jnp.exp(logits - m)
    denom = jnp.sum(e, axis=1, keepdims=True)
    # reciprocal + multiply: goes to the EUP slot instead of a VPU divide.
    out_ref[...] = (e * pl.reciprocal(denom, approx=False)).astype(out_ref.dtype)


def face_recognition_base(x, w1, b1, w2, b2, *, block_batch=128,
                          matmul_dtype=None):
    """Fused ReLU -> Linear(F,H) -> ReLU -> Linear(H,L) -> Softmax(dim=1).

    x:  (B, F)      float32
    w1: (F, H)      b1: (H,) or (1, H)      with H = F * L
    w2: (H, L)      b2: (L,) or (1, L)
    Weights are (in, out), i.e. transposed vs. torch.nn.Linear.weight.
    matmul_dtype: optionally jnp.bfloat16 on v6e/v7x to halve DMA bytes and
    double MXU rate (accumulation stays f32; bias/softmax stay f32).
    """
    B, F = x.shape
    H = w1.shape[1]
    L = w2.shape[1]

    b1 = jnp.asarray(b1, jnp.float32).reshape(1, H)
    b2 = jnp.asarray(b2, jnp.float32).reshape(1, L)

    if matmul_dtype is not None:
        x = x.astype(matmul_dtype)
        w1 = w1.astype(matmul_dtype)
        w2 = w2.astype(matmul_dtype)

    # ---- layout plumbing (wrapper side) ------------------------------------
    # Lane-dense label axis: pad L up to a multiple of 128.
    LP = _round_up(L, _LANE)
    # Batch tile: multiple of 8 sublanes; pad the batch to a tile multiple.
    TB = _round_up(min(block_batch, _round_up(B, _SUBLANE)), _SUBLANE)
    BP = _round_up(B, TB)

    x_p = x if BP == B else jnp.pad(x, ((0, BP - B), (0, 0)))
    if LP != L:
        w2_p = jnp.pad(w2, ((0, 0), (0, LP - L)))
        # Huge negative bias on padded classes -> exp() == 0 under softmax.
        b2_p = jnp.pad(b2, ((0, 0), (0, LP - L)), constant_values=-1e30)
    else:
        w2_p, b2_p = w2, b2

    # ---- VMEM budget (double-buffered x/out tiles + resident weights) ------
    in_itemsize = jnp.dtype(x_p.dtype).itemsize
    tile_bytes = (2 * TB * F * in_itemsize          # x tile, double-buffered
                  + 2 * TB * LP * 4                 # out tile, double-buffered
                  + TB * H * 4 + TB * LP * 4        # h / logits intermediates
                  + (F * H + H * LP) * in_itemsize  # resident weights
                  + (H + LP) * 4)                   # resident biases
    vmem_limit = min(64 * 1024 * 1024, max(4 * tile_bytes, 8 * 1024 * 1024))

    cost = pl.CostEstimate(
        flops=2 * BP * F * H + 2 * BP * H * LP,
        transcendentals=BP * LP,
        bytes_accessed=(x_p.size * in_itemsize
                        + w1.size * in_itemsize + w2_p.size * in_itemsize
                        + b1.size * 4 + b2_p.size * 4 + BP * LP * 4),
    )

    out_padded = pl.pallas_call(
        _face_rec_kernel,
        out_shape=jax.ShapeDtypeStruct((BP, LP), jnp.float32),
        grid_spec=pltpu.PrefetchScalarGridSpec(
            num_scalar_prefetch=0,
            grid=(pl.cdiv(BP, TB),),
            in_specs=[
                pl.BlockSpec((TB, F), lambda i: (i, 0)),   # x: tiled over batch
                pl.BlockSpec((F, H), lambda i: (0, 0)),    # w1: VMEM-resident
                pl.BlockSpec((1, H), lambda i: (0, 0)),    # b1: VMEM-resident
                pl.BlockSpec((H, LP), lambda i: (0, 0)),   # w2: VMEM-resident
                pl.BlockSpec((1, LP), lambda i: (0, 0)),   # b2: VMEM-resident
            ],
            out_specs=pl.BlockSpec((TB, LP), lambda i: (i, 0)),
        ),
        compiler_params=pltpu.CompilerParams(
            dimension_semantics=("parallel",),  # shard batch tiles across TCs (v7x)
            vmem_limit_bytes=int(vmem_limit),
        ),
        cost_estimate=cost,
    )(x_p, w1, b1, w2_p, b2_p)

    return out_padded[:B, :L]


if __name__ == "__main__":
    # Small shapes consistent with the module: features=32, num_labels=8.
    batch = 2
    features = 32
    num_labels = 8
    hidden = features * num_labels  # 256

    key = jax.random.PRNGKey(0)
    kx, k1, kb1, k2, kb2 = jax.random.split(key, 5)

    x = jax.random.normal(kx, (batch, features), dtype=jnp.float32)
    # Deterministic synthetic parameters (scaled like default Linear init ~ 1/sqrt(in)).
    w1 = jax.random.normal(k1, (features, hidden), dtype=jnp.float32) / jnp.sqrt(features)
    b1 = jax.random.normal(kb1, (1, hidden), dtype=jnp.float32) * 0.01
    w2 = jax.random.normal(k2, (hidden, num_labels), dtype=jnp.float32) / jnp.sqrt(hidden)
    b2 = jax.random.normal(kb2, (1, num_labels), dtype=jnp.float32) * 0.01

    out = face_recognition_base(x, w1, b1, w2, b2)
    out = jax.block_until_ready(out)

    # Reference check in plain JAX (same math) to make sure the kernel is correct.
    def ref(x, w1, b1, w2, b2):
        h = jnp.maximum(x, 0.0)
        h = jnp.maximum(h @ w1 + b1, 0.0)
        logits = h @ w2 + b2
        return jax.nn.softmax(logits, axis=1)

    expected = ref(x, w1, b1, w2, b2)
    assert out.shape == (batch, num_labels)
    assert jnp.allclose(out, expected, atol=1e-5, rtol=1e-5)
    assert jnp.allclose(jnp.sum(out, axis=1), 1.0, atol=1e-5)

    print("KERNEL_OK")
</pallas_src>

<mosaic_0001>
module attributes {stable_mosaic.version = 11 : i64} {
  func.func @_face_rec_kernel(%arg0: i32, %arg1: memref<8x32xf32, #tpu.memory_space<vmem>>, %arg2: memref<32x256xf32, #tpu.memory_space<vmem>>, %arg3: memref<1x256xf32, #tpu.memory_space<vmem>>, %arg4: memref<256x128xf32, #tpu.memory_space<vmem>>, %arg5: memref<1x128xf32, #tpu.memory_space<vmem>>, %arg6: memref<8x128xf32, #tpu.memory_space<vmem>>) attributes {dimension_semantics = [#tpu.dimension_semantics<parallel>], iteration_bounds = array<i64: 1>, scalar_prefetch = 0 : i64, scratch_operands = 0 : i64, tpu.core_type = #tpu.core_type<tc>, window_params = [{transform_indices = @transform_0, window_bounds = array<i64: 8, 32>}, {pipeline_mode = #tpu.pipeline_mode<synchronous>, transform_indices = @transform_1, window_bounds = array<i64: 32, 256>}, {pipeline_mode = #tpu.pipeline_mode<synchronous>, transform_indices = @transform_2, window_bounds = array<i64: 1, 256>}, {pipeline_mode = #tpu.pipeline_mode<synchronous>, transform_indices = @transform_3, window_bounds = array<i64: 256, 128>}, {pipeline_mode = #tpu.pipeline_mode<synchronous>, transform_indices = @transform_4, window_bounds = array<i64: 1, 128>}, {transform_indices = @transform_5, window_bounds = array<i64: 8, 128>}]} {
    %c0 = arith.constant 0 : index
    %c0_0 = arith.constant 0 : index
    %0 = vector.load %arg1[%c0, %c0_0] : memref<8x32xf32, #tpu.memory_space<vmem>>, vector<8x32xf32>
    %cst = arith.constant 0.000000e+00 : f32
    %1 = vector.broadcast %cst : f32 to vector<8x32xf32>
    %2 = arith.maximumf %0, %1 : vector<8x32xf32>
    %c0_1 = arith.constant 0 : index
    %c0_2 = arith.constant 0 : index
    %3 = vector.load %arg2[%c0_1, %c0_2] : memref<32x256xf32, #tpu.memory_space<vmem>>, vector<32x256xf32>
    %cst_3 = arith.constant dense<0.000000e+00> : vector<8x256xf32>
    %4 = tpu.matmul %2, %3, %cst_3 {dimension_numbers = #tpu.dot_dimension_numbers<[1], [0], [0], [1], [0, 0, 1, 1], [], []>} : vector<8x32xf32>, vector<32x256xf32>, vector<8x256xf32> -> vector<8x256xf32>
    %c0_4 = arith.constant 0 : index
    %c0_5 = arith.constant 0 : index
    %5 = vector.load %arg3[%c0_4, %c0_5] : memref<1x256xf32, #tpu.memory_space<vmem>>, vector<1x256xf32>
    %6 = vector.broadcast %5 : vector<1x256xf32> to vector<8x256xf32>
    %7 = arith.addf %4, %6 : vector<8x256xf32>
    %cst_6 = arith.constant 0.000000e+00 : f32
    %8 = vector.broadcast %cst_6 : f32 to vector<8x256xf32>
    %9 = arith.maximumf %7, %8 : vector<8x256xf32>
    %c0_7 = arith.constant 0 : index
    %c0_8 = arith.constant 0 : index
    %10 = vector.load %arg4[%c0_7, %c0_8] : memref<256x128xf32, #tpu.memory_space<vmem>>, vector<256x128xf32>
    %cst_9 = arith.constant dense<0.000000e+00> : vector<8x128xf32>
    %11 = tpu.matmul %9, %10, %cst_9 {dimension_numbers = #tpu.dot_dimension_numbers<[1], [0], [0], [1], [0, 0, 1, 1], [], []>} : vector<8x256xf32>, vector<256x128xf32>, vector<8x128xf32> -> vector<8x128xf32>
    %c0_10 = arith.constant 0 : index
    %c0_11 = arith.constant 0 : index
    %12 = vector.load %arg5[%c0_10, %c0_11] : memref<1x128xf32, #tpu.memory_space<vmem>>, vector<1x128xf32>
    %13 = vector.broadcast %12 : vector<1x128xf32> to vector<8x128xf32>
    %14 = arith.addf %11, %13 : vector<8x128xf32>
    %cst_12 = arith.constant dense<0xFF800000> : vector<8xf32>
    %15 = vector.multi_reduction <maximumf>, %14, %cst_12 [1] : vector<8x128xf32> to vector<8xf32>
    %16 = vector.shape_cast %15 : vector<8xf32> to vector<8x1xf32>
    %17 = vector.broadcast %16 : vector<8x1xf32> to vector<8x128xf32>
    %18 = arith.subf %14, %17 : vector<8x128xf32>
    %19 = math.exp %18 : vector<8x128xf32>
    %cst_13 = arith.constant dense<0.000000e+00> : vector<8xf32>
    %20 = vector.multi_reduction <add>, %19, %cst_13 [1] : vector<8x128xf32> to vector<8xf32>
    %21 = vector.shape_cast %20 : vector<8xf32> to vector<8x1xf32>
    %22 = tpu.reciprocal %21 : vector<8x1xf32> -> vector<8x1xf32>
    %23 = vector.broadcast %22 : vector<8x1xf32> to vector<8x128xf32>
    %24 = arith.mulf %19, %23 : vector<8x128xf32>
    %c0_14 = arith.constant 0 : index
    %c0_15 = arith.constant 0 : index
    %25 = vector.load %arg6[%c0_14, %c0_15] : memref<8x128xf32, #tpu.memory_space<vmem>>, vector<8x128xf32>
    tpu.vector_store %arg6[%c0_14, %c0_15], %24 {strides = array<i32>} : memref<8x128xf32, #tpu.memory_space<vmem>>, vector<8x128xf32>,
    return
  }
  func.func @transform_0(%arg0: i32) -> (i32, i32) {
    %c0_i32 = arith.constant 0 : i32
    %c0_i32_0 = arith.constant 0 : i32
    return %arg0, %c0_i32 : i32, i32
  }
  func.func @transform_1(%arg0: i32) -> (i32, i32) {
    %c0_i32 = arith.constant 0 : i32
    %c0_i32_0 = arith.constant 0 : i32
    %c0_i32_1 = arith.constant 0 : i32
    return %c0_i32, %c0_i32_0 : i32, i32
  }
  func.func @transform_2(%arg0: i32) -> (i32, i32) {
    %c0_i32 = arith.constant 0 : i32
    %c0_i32_0 = arith.constant 0 : i32
    %c0_i32_1 = arith.constant 0 : i32
    return %c0_i32, %c0_i32_0 : i32, i32
  }
  func.func @transform_3(%arg0: i32) -> (i32, i32) {
    %c0_i32 = arith.constant 0 : i32
    %c0_i32_0 = arith.constant 0 : i32
    %c0_i32_1 = arith.constant 0 : i32
    return %c0_i32, %c0_i32_0 : i32, i32
  }
  func.func @transform_4(%arg0: i32) -> (i32, i32) {
    %c0_i32 = arith.constant 0 : i32
    %c0_i32_0 = arith.constant 0 : i32
    %c0_i32_1 = arith.constant 0 : i32
    return %c0_i32, %c0_i32_0 : i32, i32
  }
  func.func @transform_5(%arg0: i32) -> (i32, i32) {
    %c0_i32 = arith.constant 0 : i32
    %c0_i32_0 = arith.constant 0 : i32
    return %arg0, %c0_i32 : i32, i32
  }
}

</mosaic_0001>

<bundles_post_ra>
// kernel: tpu_custom_call.1
= control target key start
LH: loop header
LB: loop body
LE: loop exit
PB: predicated region body
PF: predicated region fallthrough
CT: control target
= control target key end

     0   :  { %10 = vsyncpa [#allocation3], 0  ;;  %s571_s0 = inlined_call_operand.hbm [shape: f32[8,32], index: 0, kind: input, shape index: {}]   ;;  %s572_s1 = inlined_call_operand.hbm [shape: f32[32,256], index: 1, kind: input, shape index: {}]   ;;  %s573_s2 = inlined_call_operand.vmem [shape: f32[1,256], index: 2, kind: input, shape index: {}]   ;;  %s574_s3 = inlined_call_operand.hbm [shape: f32[256,128], index: 3, kind: input, shape index: {}]   ;;  %s575_s4 = inlined_call_operand.vmem [shape: f32[1,128], index: 4, kind: input, shape index: {}]   ;;  %s576_s5 = inlined_call_operand.hbm [shape: f32[8,128], index: 5, kind: output, shape index: {}]  }
   0x1   :  { %11 = vsyncpa [#allocation6], 0 }
   0x2   :  { %12 = vsyncpa [#allocation4], 0  ;;  %s478_s18 = smov [#allocation5]   ;;  %s384_s22 = scalar_lea.hbm %s572_s1, 1024 }
   0x3   :  { %s28_s19 = sshll.u32 %s478_s18, 4  ;;  %p385_p0 = scmp.ne.s32.totalorder %s572_s1, %s384_s22  ;;  %s29_s19 = int_to_ptr.vmem [resolvable:$true] %s28_s19 }
   0x4   :  { %p388_p1 = scmp.lt.u32.totalorder %s384_s22, %s572_s1 }
   0x6   :  { %p390_p2 = pnand %p388_p1, %p385_p0 }
   0x8   :  { %393 = shalt.err (!%p390_p2)
}
   0x9   :  { %s394_s27 = scalar_lea.vmem %s29_s19, 1024  ;;  %p399_p4 = scmp.lt.s32.totalorder %s29_s19, %s29_s19 }
   0xa   :  { %p395_p3 = scmp.ne.s32.totalorder %s29_s19, %s394_s27  ;;  %p400_p5 = scmp.lt.s32.totalorder %s394_s27, %s394_s27 }
   0xc   :  { %p401_p6 = por %p400_p5, %p399_p4 }
   0xe   :  { %p402_p7 = pnand %p401_p6, %p395_p3 }
  0x10   :  { %405 = shalt.err (!%p402_p7)
}
  0x11   :  { %s479_s28 = smov 256   ;;  %s480_s29 = smov 16  }
  0x12   :  { %34 = dma.hbm_to_vmem [thread:$0]  %s572_s1, 1024, %s29_s19, [#allocation6], %s479_s28, %s479_s28, %s480_s29  }
  0x13   :  { %s481_s7 = smov [#allocation2]   ;;  %s482_s9 = smov [#allocation7]  }
  0x14   :  { %s19_s8 = sshll.u32 %s481_s7, 4  ;;  %s42_s10 = sshll.u32 %s482_s9, 4  ;;  %s20_s8 = int_to_ptr.vmem [resolvable:$true] %s19_s8  ;;  %s43_s10 = int_to_ptr.vmem [resolvable:$true] %s42_s10 }
  0x15   :  { %s406_s13 = scalar_lea.hbm %s571_s0, 128 }
  0x16   :  { %p407_p8 = scmp.ne.s32.totalorder %s571_s0, %s406_s13  ;;  %p410_p9 = scmp.lt.u32.totalorder %s406_s13, %s571_s0 }
  0x18   :  { %p412_p10 = pnand %p410_p9, %p407_p8 }
  0x1a   :  { %415 = shalt.err (!%p412_p10)
}
  0x1b   :  { %s416_s1 = scalar_lea.vmem %s20_s8, 128  ;;  %p421_p12 = scmp.lt.s32.totalorder %s20_s8, %s20_s8 }
  0x1c   :  { %p417_p11 = scmp.ne.s32.totalorder %s20_s8, %s416_s1  ;;  %p422_p13 = scmp.lt.s32.totalorder %s416_s1, %s416_s1 }
  0x1e   :  { %p423_p0 = por %p422_p13, %p421_p12 }
  0x20   :  { %p424_p1 = pnand %p423_p0, %p417_p11 }
  0x22   :  { %427 = shalt.err (!%p424_p1)
}
  0x23   :  { %22 = dma.hbm_to_vmem [thread:$0]  %s571_s0, 128, %s20_s8, [#allocation3]  }
  0x24   :  { %s428_s22 = scalar_lea.hbm %s574_s3, 4096 }
  0x25   :  { %p429_p2 = scmp.ne.s32.totalorder %s574_s3, %s428_s22  ;;  %p432_p3 = scmp.lt.u32.totalorder %s428_s22, %s574_s3 }
  0x27   :  { %p434_p4 = pnand %p432_p3, %p429_p2 }
  0x29   :  { %437 = shalt.err (!%p434_p4)
}
  0x2a   :  { %s438_s27 = scalar_lea.vmem %s43_s10, 4096  ;;  %p443_p6 = scmp.lt.s32.totalorder %s43_s10, %s43_s10 }
  0x2b   :  { %p439_p5 = scmp.ne.s32.totalorder %s43_s10, %s438_s27  ;;  %p444_p7 = scmp.lt.s32.totalorder %s438_s27, %s438_s27 }
  0x2d   :  { %p445_p8 = por %p444_p7, %p443_p6 }
  0x2f   :  { %p446_p9 = pnand %p445_p8, %p439_p5 }
  0x31   :  { %449 = shalt.err (!%p446_p9)
}
  0x32   :  { %s483_s0 = smov 128   ;;  %s484_s28 = smov 8  }
  0x33   :  { %48 = dma.hbm_to_vmem [thread:$0]  %s574_s3, 4096, %s43_s10, [#allocation6], %s483_s0, %s483_s0, %s484_s28  }
  0x34   :  { %472 = dma.done.wait [#allocation3], 128  }
  0x35   :  { %473 = vsyncadd [#allocation3], 4294967168 }
  0x36   :  { %474 = dma.done.wait [#allocation6], 5120  }
  0x37   :  { %475 = vsyncadd [#allocation6], 4294962176  ;;  %v485_v0 = vmov 0.0   ;;  %v63_v1 = vld [vmem:[#allocation5 + $0x8] sm:$0xff]  ;;  %v65_v2 = vld [vmem:[#allocation5 + $0x18] sm:$0xff]  ;;  %vm82_vm0 = vcmask 261120   ;;  %v72_v63 = vlaneseq }
  0x38   :  { %150 = vmatprep.mubr.f32.mxu0 %v485_v0  ;;  %v62_v3 = vld [vmem:[#allocation5] sm:$0xff]  ;;  %v331_v4 = vpack.c.bf16 %v65_v2, %v63_v1  ;;  %v64_v5 = vld [vmem:[#allocation5 + $0x10] sm:$0xff]  ;;  %v67_v6 = vld [vmem:[#allocation5 + $0x28] sm:$0xff] }
  0x39   :  { %v69_v7 = vld [vmem:[#allocation5 + $0x38] sm:$0xff]  ;;  %v333_v8 = vpack.c.bf16 %v64_v5, %v62_v3  ;;  %v66_v10 = vld [vmem:[#allocation5 + $0x20] sm:$0xff]  ;;  %v68_v11 = vld [vmem:[#allocation5 + $0x30] sm:$0xff]  ;;  %v73_v0 = vshrl.u32 %v72_v63, 7 }
  0x3a   :  { %v335_v9 = vpack.c.bf16 %v69_v7, %v67_v6  ;;  %v60_v12 = vld [vmem:[#allocation2] sm:$0xff]  ;;  %332 = vmatprep.subr.bf16.mxu0 %v331_v4  ;;  %v175_v13 = vld [vmem:[#allocation7 + $0x80] sm:$0xff]  ;;  %v176_v14 = vld [vmem:[#allocation7 + $0x88] sm:$0xff]  ;;  %v337_v16 = vpack.c.bf16 %v68_v11, %v66_v10 }
  0x3b   :  { %v159_v15 = vld [vmem:[#allocation7] sm:$0xff]  ;;  %334 = vmatpush1.bf16.msra.mxu0 %v333_v8  ;;  %v339_v17 = vpack.c.bf16 %v176_v14, %v175_v13  ;;  %v160_v18 = vld [vmem:[#allocation7 + $0x8] sm:$0xff]  ;;  %v177_v19 = vld [vmem:[#allocation7 + $0x90] sm:$0xff]  ;;  %v61_v27 = vmax.f32 %v60_v12, 0.0  ;;  %v74_v1 = vsub.s32 0, %v73_v0  ;;  %v78_v3 = vsub.s32 1, %v73_v0 }
  0x3c   :  { %v178_v20 = vld [vmem:[#allocation7 + $0x98] sm:$0xff]  ;;  %336 = vmatprep.subr.bf16.mxu0 %v335_v9  ;;  %v341_v21 = vpack.c.bf16 %v160_v18, %v159_v15  ;;  %v161_v23 = vld [vmem:[#allocation7 + $0x10] sm:$0xff]  ;;  %v179_v25 = vld [vmem:[#allocation7 + $0xa0] sm:$0xff] }
  0x3d   :  { %v343_v22 = vpack.c.bf16 %v178_v20, %v177_v19  ;;  %v162_v24 = vld [vmem:[#allocation7 + $0x18] sm:$0xff]  ;;  %340 = vmatprep.subr.bf16.mxu1 %v339_v17  ;;  %v180_v26 = vld [vmem:[#allocation7 + $0xa8] sm:$0xff]  ;;  %v163_v30 = vld [vmem:[#allocation7 + $0x20] sm:$0xff] }
  0x3e   :  { %342 = vmatpush3.bf16.msra.mxu1 %v341_v21  ;;  %v345_v28 = vpack.c.bf16 %v162_v24, %v161_v23  ;;  %v347_v29 = vpack.c.bf16 %v180_v26, %v179_v25  ;;  %v164_v31 = vld [vmem:[#allocation7 + $0x28] sm:$0xff]  ;;  %v181_v32 = vld [vmem:[#allocation7 + $0xb0] sm:$0xff]  ;;  %v182_v33 = vld [vmem:[#allocation7 + $0xb8] sm:$0xff] }
  0x3f   :  { %338 = vmatpush1.bf16.msra.mxu0 %v337_v16  ;;  %344 = vmatprep.subr.bf16.mxu1 %v343_v22  ;;  %v349_v34 = vpack.c.bf16 %v164_v31, %v163_v30  ;;  %v351_v35 = vpack.c.bf16 %v182_v33, %v181_v32  ;;  %v165_v36 = vld [vmem:[#allocation7 + $0x30] sm:$0xff]  ;;  %v166_v37 = vld [vmem:[#allocation7 + $0x38] sm:$0xff]  ;;  %v183_v38 = vld [vmem:[#allocation7 + $0xc0] sm:$0xff] }
  0x40   :  { %v184_v39 = vld [vmem:[#allocation7 + $0xc8] sm:$0xff]  ;;  %v353_v40 = vpack.c.bf16 %v166_v37, %v165_v36  ;;  %v167_v42 = vld [vmem:[#allocation7 + $0x40] sm:$0xff]  ;;  %v185_v44 = vld [vmem:[#allocation7 + $0xd0] sm:$0xff] }
  0x41   :  { %v355_v41 = vpack.c.bf16 %v184_v39, %v183_v38  ;;  %v168_v43 = vld [vmem:[#allocation7 + $0x48] sm:$0xff]  ;;  %v186_v45 = vld [vmem:[#allocation7 + $0xd8] sm:$0xff]  ;;  %v169_v48 = vld [vmem:[#allocation7 + $0x50] sm:$0xff] }
  0x42   :  { %294 = vmatmul.mubr.msk.f32.vlgmr.msra.gmra.mrb[0].mxu0 %vm82_vm0, %v61_v27  ;;  %346 = vmatpush3.bf16.msra.mxu1 %v345_v28  ;;  %v357_v46 = vpack.c.bf16 %v168_v43, %v167_v42  ;;  %v359_v47 = vpack.c.bf16 %v186_v45, %v185_v44  ;;  %v170_v49 = vld [vmem:[#allocation7 + $0x58] sm:$0xff]  ;;  %v187_v50 = vld [vmem:[#allocation7 + $0xe0] sm:$0xff]  ;;  %v188_v51 = vld [vmem:[#allocation7 + $0xe8] sm:$0xff] }
  0x43   :  { %348 = vmatprep.subr.bf16.mxu1 %v347_v29  ;;  %v361_v52 = vpack.c.bf16 %v170_v49, %v169_v48  ;;  %v363_v53 = vpack.c.bf16 %v188_v51, %v187_v50  ;;  %v171_v54 = vld [vmem:[#allocation7 + $0x60] sm:$0xff]  ;;  %v172_v55 = vld [vmem:[#allocation7 + $0x68] sm:$0xff]  ;;  %v189_v57 = vld [vmem:[#allocation7 + $0xf0] sm:$0xff] }
  0x44   :  { %v365_v56 = vpack.c.bf16 %v172_v55, %v171_v54  ;;  %v190_v58 = vld [vmem:[#allocation7 + $0xf8] sm:$0xff]  ;;  %v173_v60 = vld [vmem:[#allocation7 + $0x70] sm:$0xff] }
  0x45   :  { %v367_v59 = vpack.c.bf16 %v190_v58, %v189_v57  ;;  %v174_v61 = vld [vmem:[#allocation7 + $0x78] sm:$0xff] }
  0x46   :  { %350 = vmatpush3.bf16.msra.mxu1 %v349_v34  ;;  %v369_v62 = vpack.c.bf16 %v174_v61, %v173_v60  ;;  %v70_v2 = vld [vmem:[%s573_s2] sm:$0x3]  ;;  %s486_s2 = smov [#allocation8]  }
  0x47   :  { %352 = vmatprep.subr.bf16.mxu1 %v351_v35  ;;  %v75_v4 = vrot.slane %v70_v2, %v74_v1  ;;  %v79_v5 = vrot.slane %v70_v2, %v78_v3  ;;  %v295_v14 = vld [vmem:[%s575_s4] ss:$0 sm:$0xff]  ;;  %s284_s9 = sshll.u32 %s486_s2, 4  ;;  %s285_s9 = int_to_ptr.vmem [resolvable:$true] %s284_s9 }
  0x48   :  { %s450_s10 = scalar_lea.vmem %s285_s9, 128  ;;  %p455_p11 = scmp.lt.s32.totalorder %s285_s9, %s285_s9 }
  0x49   :  { %p451_p10 = scmp.ne.s32.totalorder %s285_s9, %s450_s10  ;;  %p456_p12 = scmp.lt.s32.totalorder %s450_s10, %s450_s10 }
  0x4a   :  { %354 = vmatpush3.bf16.msra.mxu1 %v353_v40 }
  0x4b   :  { %356 = vmatprep.subr.bf16.mxu1 %v355_v41  ;;  %p457_p13 = por %p456_p12, %p455_p11 }
  0x4d   :  { %p458_p0 = pnand %p457_p13, %p451_p10 }
  0x4e   :  { %358 = vmatpush3.bf16.msra.mxu1 %v357_v46 }
  0x4f   :  { %360 = vmatprep.subr.bf16.mxu1 %v359_v47 }
  0x52   :  { %362 = vmatpush3.bf16.msra.mxu1 %v361_v52 }
  0x53   :  { %364 = vmatprep.subr.bf16.mxu1 %v363_v53 }
  0x56   :  { %366 = vmatpush3.bf16.msra.mxu1 %v365_v56 }
  0x57   :  { %368 = vmatprep.subr.bf16.mxu1 %v367_v59 }
  0x5a   :  { %370 = vmatpush3.bf16.msra.mxu1 %v369_v62 }
 0x115   :  { %v152_v6 = vpop.f32.mrb[0].mxu0 }
 0x116   :  { %v153_v7 = vadd.f32 %v152_v6, %v75_v4  ;;  %v154_v8 = vpop.f32.mrb[1].mxu0 }
 0x117   :  { %v155_v9 = vadd.f32 %v154_v8, %v79_v5 }
 0x118   :  { %v157_v11 = vmax.f32 %v153_v7, 0.0 }
 0x119   :  { %v158_v10 = vmax.f32 %v155_v9, 0.0 }
 0x11b   :  { %262 = vmatprep.mubr.f32.mxu1 %v158_v10 }
 0x11c   :  { %263 = vmatmul.mubr.f32.vlgmr.msra.gmra.mrb[0].mxu1 %v157_v11 }
 0x1ef   :  { %v328_v12 = vpop.f32.mrb[0].mxu1 }
 0x1f0   :  { %v329_v13 = vpop.f32.mrb[1].mxu1 }
 0x1f1   :  { %v330_v15 = vadd.f32 %v329_v13, %v328_v12 }
 0x1f3   :  { %v265_v16 = vadd.f32 %v330_v15, %v295_v14 }
 0x1f5   :  { %268 = vmax.xlane.f32.xlu0 %v265_v16 }
 0x282   :  { %v269_v17 = vpop.xlane.xlu0 %268 }
 0x283   :  { %v270_v18 = vsub.f32 %v265_v16, %v269_v17 }
 0x285   :  { %v271_v19 = vmul.f32 1.442695, %v270_v18 }
 0x287   :  { %380 = vpow2.f32 %v271_v19 }
 0x291   :  { %v381_v20 = vpop.eup %380 }
 0x292   :  { %273 = vadd.xlane.f32.xlu0 %v381_v20 }
 0x31f   :  { %v274_v21 = vpop.xlane.xlu0 %273 }
 0x320   :  { %382 = vrcp.f32 %v274_v21 }
 0x32a   :  { %v383_v22 = vpop.eup %382 }
 0x32b   :  { %v276_v23 = vmul.f32 %v383_v22, %v381_v20 }
 0x32d   :  { %277 = vst [vmem:[#allocation8] sm:$0xff] %v276_v23 }
 0x32e   :  { %461 = shalt.err (!%p458_p0)
}
 0x32f   :  { %s462_s12 = scalar_lea.hbm %s576_s5, 128 }
 0x330   :  { %p463_p1 = scmp.ne.s32.totalorder %s576_s5, %s462_s12  ;;  %p466_p2 = scmp.lt.u32.totalorder %s462_s12, %s576_s5 }
 0x332   :  { %p468_p3 = pnand %p466_p2, %p463_p1 }
 0x334   :  { %471 = shalt.err (!%p468_p3)
}
 0x335   :  { %287 = dma.vmem_to_hbm [thread:$0]  %s285_s9, 128, %s576_s5, [#allocation4]  }
 0x336   :  { %476 = dma.done.wait [#allocation4], 128  }
 0x337   :  { %477 = vsyncadd [#allocation4], 4294967168 }
 0x338   :  { %291 = vsyncpa [#allocation3], 1 }
 0x339   :  { %292 = vsyncpa [#allocation6], 1 }
 0x33a   :  { %293 = vsyncpa [#allocation4], 1 }

</bundles_post_ra>
